<compile_context>
chip_gen: v7x
topology: tpu7x:2x2x1
jax: 0.10.0
libtpu: 0.0.40
codegen_flags: <defaults>
</compile_context>

<pallas_src>
import jax
import jax.numpy as jnp
from jax import lax
from jax.experimental import pallas as pl
from jax.experimental.pallas import tpu as pltpu


# ------------------------------ Pallas kernels ------------------------------


def _torgb_kernel(x_ref, wmod_ref, brgb_ref, o_ref):
    # One grid step == (batch element b, spatial tile s).
    x = x_ref[0]                                                # (Cin, THW)
    w = wmod_ref[0]                                             # (Cout, Cin), f32
    out = jnp.dot(w, x, preferred_element_type=jnp.float32)     # (Cout, THW) f32 acc
    out = out + brgb_ref[...]                                   # (Cout, 1) bcast, f32
    o_ref[...] = out[None].astype(o_ref.dtype)


def _torgb_skip_kernel(x_ref, wmod_ref, brgb_ref, skip_ref, o_ref):
    x = x_ref[0]                                                # (Cin, THW)
    w = wmod_ref[0]                                             # (Cout, Cin), f32
    out = jnp.dot(w, x, preferred_element_type=jnp.float32)     # (Cout, THW) f32 acc
    # Bias + fused upsample-skip add in f32 before the final cast.
    out = out + brgb_ref[...] + skip_ref[0].astype(jnp.float32)
    o_ref[...] = out[None].astype(o_ref.dtype)


# ------------------------------ wrapper --------------------------------------


def _pick_tile_hw(hw, bytes_per_lane_col, budget_bytes=10 * 1024 * 1024):
    """Largest lane-dense tile (multiple of 128) dividing hw within a VMEM budget."""
    if hw % 128 == 0:
        for cand in (32768, 16384, 8192, 4096, 2048, 1024, 512, 256, 128):
            if cand <= hw and hw % cand == 0 and cand * bytes_per_lane_col <= budget_bytes:
                return cand
    # Fallback: full-extent block (always legal w.r.t. the (8,128) rule).
    return hw


def torgb_modconv1x1(x, w_mod, b_rgb, skip=None):
    """x: (B, Cin, H, W); w_mod: (B, Cout, Cin) f32; skip: optional (B, Cout, H, W).

    Returns (B, Cout, H, W) in x.dtype.  The 1x1 modulated conv is a per-sample
    channel matmul with HW flattened onto the lane axis.
    """
    B, Cin, H, W = x.shape
    Cout = w_mod.shape[1]
    HW = H * W

    x2 = x.reshape(B, Cin, HW)
    brgb = b_rgb.reshape(Cout, 1).astype(jnp.float32)
    w_mod = w_mod.astype(jnp.float32)

    x_isz = jnp.dtype(x.dtype).itemsize
    out_isz = x_isz
    skip_isz = jnp.dtype(skip.dtype).itemsize if skip is not None else 0
    bytes_per_col = Cin * x_isz + Cout * out_isz + (Cout * skip_isz if skip is not None else 0)

    tile_hw = _pick_tile_hw(HW, bytes_per_col)
    n_tiles = HW // tile_hw

    in_specs = [
        pl.BlockSpec((1, Cin, tile_hw), lambda b, s: (b, 0, s)),   # x tile
        pl.BlockSpec((1, Cout, Cin), lambda b, s: (b, 0, 0)),      # per-sample w_mod
        pl.BlockSpec((Cout, 1), lambda b, s: (0, 0)),              # rgb bias
    ]
    inputs = [x2, w_mod, brgb]
    if skip is not None:
        in_specs.append(pl.BlockSpec((1, Cout, tile_hw), lambda b, s: (b, 0, s)))
        inputs.append(skip.reshape(B, Cout, HW))
        kernel = _torgb_skip_kernel
    else:
        kernel = _torgb_kernel

    # Explicit scoped-VMEM limit: double-buffered streamed tiles + headroom,
    # clamped so the same code works on v5e (16 MiB default) and v7x (64 MiB phys).
    tile_bytes = tile_hw * bytes_per_col
    vmem_limit = int(min(max(4 * tile_bytes, 16 * 1024 * 1024), 64 * 1024 * 1024))

    out = pl.pallas_call(
        kernel,
        out_shape=jax.ShapeDtypeStruct((B, Cout, HW), x.dtype),
        grid_spec=pltpu.PrefetchScalarGridSpec(
            num_scalar_prefetch=0,
            grid=(B, n_tiles),
            in_specs=in_specs,
            out_specs=pl.BlockSpec((1, Cout, tile_hw), lambda b, s: (b, 0, s)),
        ),
        compiler_params=pltpu.CompilerParams(
            dimension_semantics=("parallel", "parallel"),
            vmem_limit_bytes=vmem_limit),
    )(*inputs)
    return out.reshape(B, Cout, H, W)


# TODO(synk): Upsample (upfirdn2d) is a tiny depthwise FIR resampling; kept in
# plain JAX (lax.conv_general_dilated) rather than Pallas — not the hot path.
def upsample2x(y, resample_kernel=(1, 3, 3, 1), gain=1.0, factor=2):
    k = jnp.asarray(resample_kernel, dtype=jnp.float32)
    k = jnp.outer(k, k)
    k = k / jnp.sum(k) * (gain * factor ** 2)
    kh, kw = k.shape
    p = kw - factor
    pad0 = (p + 1) // 2 + factor - 1
    pad1 = p // 2
    B, C, H, W = y.shape
    w = jnp.tile(k[::-1, ::-1][None, None], (C, 1, 1, 1))   # (C, 1, kh, kw) depthwise
    out = lax.conv_general_dilated(
        y.astype(jnp.float32), w,
        window_strides=(1, 1),
        padding=((pad0, pad1 + factor - 1), (pad0, pad1 + factor - 1)),
        lhs_dilation=(factor, factor),
        dimension_numbers=("NCHW", "OIHW", "NCHW"),
        feature_group_count=C)
    return out.astype(y.dtype)


def torgb_forward(x, dlatents, w_style, b_style, w_conv, b_rgb, y=None):
    """Full ToRGB forward. x: (B,Cin,H,W), dlatents: (B,D), y: optional (B,Cout,H/2,W/2)."""
    D = dlatents.shape[-1]
    Cin = x.shape[1]
    style_scale = 1.0 / float(D) ** 0.5     # EqualizedLinear scale (lrmul=1)
    conv_scale = 1.0 / float(Cin) ** 0.5    # fan_in = Cin * 1 * 1 (kernel=1)

    # Style projection + weight modulation hoisted out of the kernel (B*D*Cin flops,
    # negligible vs. the Cin*HW streaming cost); all in f32.
    style = (dlatents.astype(jnp.float32)
             @ (w_style.astype(jnp.float32) * style_scale)) + b_style.reshape(1, Cin)
    w_mod = (w_conv.astype(jnp.float32) * conv_scale)[None, :, :] * style[:, None, :]

    skip = upsample2x(y) if y is not None else None   # fused into the kernel epilogue
    return torgb_modconv1x1(x, w_mod, b_rgb, skip=skip)


def torgb_ref(x, dlatents, w_style, b_style, w_conv, b_rgb, y=None):
    """Pure-JAX reference of the same semantics (for verification)."""
    D = dlatents.shape[-1]
    Cin = x.shape[1]
    style = dlatents @ (w_style * (1.0 / float(D) ** 0.5)) + b_style          # (B, Cin)
    w_mod = w_conv[None] * (1.0 / float(Cin) ** 0.5) * style[:, None, :]      # (B, Cout, Cin)
    out = jnp.einsum("boi,bihw->bohw", w_mod, x) + b_rgb.reshape(1, -1, 1, 1)
    if y is not None:
        out = out + upsample2x(y)
    return out


if __name__ == "__main__":
    B, D, Cin, Cout, H, W = 2, 32, 4, 3, 16, 16
    key = jax.random.PRNGKey(0)
    k1, k2, k3, k4, k5 = jax.random.split(key, 5)

    x = jax.random.normal(k1, (B, Cin, H, W), jnp.float32)          # NCHW, like PyTorch
    dlatents = jax.random.normal(k2, (B, D), jnp.float32)
    y = jax.random.normal(k3, (B, Cout, H // 2, W // 2), jnp.float32)

    # Deterministic synthetic parameters (shapes from __init__ of the module).
    w_style = jax.random.normal(k4, (D, Cin), jnp.float32)          # modulation linear
    b_style = jnp.ones((Cin,), jnp.float32)                         # bias_init = 1
    w_conv = jax.random.normal(k5, (Cout, Cin), jnp.float32)        # 1x1 conv weight
    b_rgb = jnp.zeros((Cout,), jnp.float32)                         # self.bias (zeros)

    # f32 path, with the upsampled skip fused into the kernel.
    out = jax.block_until_ready(
        torgb_forward(x, dlatents, w_style, b_style, w_conv, b_rgb, y=y))
    ref = torgb_ref(x, dlatents, w_style, b_style, w_conv, b_rgb, y=y)
    assert out.shape == (B, Cout, H, W), out.shape
    assert jnp.allclose(out, ref, atol=1e-4, rtol=1e-4), "mismatch vs reference (y)"

    # y=None path.
    out2 = jax.block_until_ready(
        torgb_forward(x, dlatents, w_style, b_style, w_conv, b_rgb, y=None))
    ref2 = torgb_ref(x, dlatents, w_style, b_style, w_conv, b_rgb, y=None)
    assert jnp.allclose(out2, ref2, atol=1e-4, rtol=1e-4), "mismatch vs reference (no y)"

    # bf16-I/O path (halves HBM traffic; f32 accumulation inside the kernel).
    out3 = jax.block_until_ready(
        torgb_forward(x.astype(jnp.bfloat16), dlatents, w_style, b_style, w_conv,
                      b_rgb, y=y.astype(jnp.bfloat16)))
    assert out3.dtype == jnp.bfloat16
    assert jnp.allclose(out3.astype(jnp.float32), ref, atol=1e-1, rtol=1e-1), \
        "mismatch vs reference (bf16 I/O)"

    print("KERNEL_OK")
</pallas_src>

<mosaic_0001>
module attributes {stable_mosaic.version = 11 : i64} {
  func.func @_torgb_skip_kernel(%arg0: i32, %arg1: i32, %arg2: memref<1x4x256xf32, #tpu.memory_space<vmem>>, %arg3: memref<1x3x4xf32, #tpu.memory_space<vmem>>, %arg4: memref<3x1xf32, #tpu.memory_space<vmem>>, %arg5: memref<1x3x256xf32, #tpu.memory_space<vmem>>, %arg6: memref<1x3x256xf32, #tpu.memory_space<vmem>>) attributes {dimension_semantics = [#tpu.dimension_semantics<parallel>, #tpu.dimension_semantics<parallel>], iteration_bounds = array<i64: 2, 1>, scalar_prefetch = 0 : i64, scratch_operands = 0 : i64, tpu.core_type = #tpu.core_type<tc>, window_params = [{transform_indices = @transform_0, window_bounds = array<i64: 1, 4, 256>}, {transform_indices = @transform_1, window_bounds = array<i64: 1, 3, 4>}, {pipeline_mode = #tpu.pipeline_mode<synchronous>, transform_indices = @transform_2, window_bounds = array<i64: 3, 1>}, {transform_indices = @transform_3, window_bounds = array<i64: 1, 3, 256>}, {transform_indices = @transform_4, window_bounds = array<i64: 1, 3, 256>}]} {
    %c0 = arith.constant 0 : index
    %c0_0 = arith.constant 0 : index
    %c0_1 = arith.constant 0 : index
    %0 = vector.load %arg2[%c0, %c0_0, %c0_1] : memref<1x4x256xf32, #tpu.memory_space<vmem>>, vector<1x4x256xf32>
    %1 = vector.shape_cast %0 : vector<1x4x256xf32> to vector<4x256xf32>
    %c0_2 = arith.constant 0 : index
    %c0_3 = arith.constant 0 : index
    %c0_4 = arith.constant 0 : index
    %2 = vector.load %arg3[%c0_2, %c0_3, %c0_4] : memref<1x3x4xf32, #tpu.memory_space<vmem>>, vector<1x3x4xf32>
    %3 = vector.shape_cast %2 : vector<1x3x4xf32> to vector<3x4xf32>
    %cst = arith.constant dense<0.000000e+00> : vector<3x256xf32>
    %4 = tpu.matmul %3, %1, %cst {dimension_numbers = #tpu.dot_dimension_numbers<[1], [0], [0], [1], [0, 0, 1, 1], [], []>} : vector<3x4xf32>, vector<4x256xf32>, vector<3x256xf32> -> vector<3x256xf32>
    %c0_5 = arith.constant 0 : index
    %c0_6 = arith.constant 0 : index
    %5 = vector.load %arg4[%c0_5, %c0_6] : memref<3x1xf32, #tpu.memory_space<vmem>>, vector<3x1xf32>
    %6 = vector.broadcast %5 : vector<3x1xf32> to vector<3x256xf32>
    %7 = arith.addf %4, %6 : vector<3x256xf32>
    %c0_7 = arith.constant 0 : index
    %c0_8 = arith.constant 0 : index
    %c0_9 = arith.constant 0 : index
    %8 = vector.load %arg5[%c0_7, %c0_8, %c0_9] : memref<1x3x256xf32, #tpu.memory_space<vmem>>, vector<1x3x256xf32>
    %9 = vector.shape_cast %8 : vector<1x3x256xf32> to vector<3x256xf32>
    %10 = arith.addf %7, %9 : vector<3x256xf32>
    %11 = vector.shape_cast %10 : vector<3x256xf32> to vector<1x3x256xf32>
    %c0_10 = arith.constant 0 : index
    %c0_11 = arith.constant 0 : index
    %c0_12 = arith.constant 0 : index
    %12 = vector.load %arg6[%c0_10, %c0_11, %c0_12] : memref<1x3x256xf32, #tpu.memory_space<vmem>>, vector<1x3x256xf32>
    tpu.vector_store %arg6[%c0_10, %c0_11, %c0_12], %11 {strides = array<i32>} : memref<1x3x256xf32, #tpu.memory_space<vmem>>, vector<1x3x256xf32>,
    return
  }
  func.func @transform_0(%arg0: i32, %arg1: i32) -> (i32, i32, i32) {
    %c0_i32 = arith.constant 0 : i32
    %c0_i32_0 = arith.constant 0 : i32
    return %arg0, %c0_i32, %arg1 : i32, i32, i32
  }
  func.func @transform_1(%arg0: i32, %arg1: i32) -> (i32, i32, i32) {
    %c0_i32 = arith.constant 0 : i32
    %c0_i32_0 = arith.constant 0 : i32
    %c0_i32_1 = arith.constant 0 : i32
    return %arg0, %c0_i32, %c0_i32_0 : i32, i32, i32
  }
  func.func @transform_2(%arg0: i32, %arg1: i32) -> (i32, i32) {
    %c0_i32 = arith.constant 0 : i32
    %c0_i32_0 = arith.constant 0 : i32
    %c0_i32_1 = arith.constant 0 : i32
    return %c0_i32, %c0_i32_0 : i32, i32
  }
  func.func @transform_3(%arg0: i32, %arg1: i32) -> (i32, i32, i32) {
    %c0_i32 = arith.constant 0 : i32
    %c0_i32_0 = arith.constant 0 : i32
    return %arg0, %c0_i32, %arg1 : i32, i32, i32
  }
  func.func @transform_4(%arg0: i32, %arg1: i32) -> (i32, i32, i32) {
    %c0_i32 = arith.constant 0 : i32
    %c0_i32_0 = arith.constant 0 : i32
    return %arg0, %c0_i32, %arg1 : i32, i32, i32
  }
}

</mosaic_0001>

<bundles_post_ra>
// kernel: tpu_custom_call.1
= control target key start
LH: loop header
LB: loop body
LE: loop exit
PB: predicated region body
PF: predicated region fallthrough
CT: control target
= control target key end

     0   :  { %s608_s15 = smov 0   ;;  %s610_s16 = smov 0   ;;  %s650_s0 = inlined_call_operand.vmem [shape: f32[2,4,256], index: 0, kind: input, shape index: {}]   ;;  %s651_s1 = inlined_call_operand.vmem [shape: f32[2,3,4], index: 1, kind: input, shape index: {}]   ;;  %s652_s2 = inlined_call_operand.vmem [shape: f32[3,1], index: 2, kind: input, shape index: {}]   ;;  %s653_s3 = inlined_call_operand.vmem [shape: f32[2,3,256], index: 3, kind: input, shape index: {}]   ;;  %s654_s4 = inlined_call_operand.vmem [shape: f32[2,3,256], index: 4, kind: output, shape index: {}]  }
   0x1   :  { %s612_s17 = smov 0  }
   0x2 LB: > { %s26_s18 = sadd.s32 1, %s575_s16  ;;  %p512_p0 = scmp.ge.s32.totalorder %s579_s17, 1  ;;  %s579_s17 = sphi %s612_s17, %s14_s17   ;;  %s575_s16 = sphi %s610_s16, %s656_s16   ;;  %s571_s15 = sphi %s608_s15, %s655_s15  }
   0x3   : > { %p28_p1 = scmp.ge.s32.totalorder %s26_s18, 2  ;;  %p209_p2 = scmp.lt.s32.totalorder %s579_s17, 3 }
   0x5   : > { %s658_s18 = smov (%p28_p1, %s26_s18), 0  ;;  %p210_p3 = pnand %p512_p0, %p209_p2 }
   0x6   : > { %p257_p4 = scmp.lt.s32.totalorder (!%p210_p3), %s571_s15, 1  ;;  %v581_v0 = vmov (!%p210_p3), 0.0   ;;  %v582_v1 = vmov (!%p210_p3), 0   ;;  %v292_v2 = vld [vmem:[%s652_s2] sm:$0x7] (!%p210_p3)  ;;  %vm304_vm0 = vcmask (!%p210_p3), 1043456  }
   0x7   : > { %213 = sbr.rel (%p210_p3) target bundleno = 242 (0xf2), region = 36  ;;  %373 = vmatprep.mubr.f32.mxu0 (!%p210_p3), %v581_v0  ;;  %554 = vset.pattern.permute.xlu0 (!%p210_p3), %v582_v1  ;;  %vm300_vm1 = vcmask (!%p210_p3), 31744  }
   0x8   : > { %295 = vperm.xlu0 (!%p210_p3), %554, %v292_v2  }
   0xe   : > { %s660_s15 = smov (!%p257_p4, %s571_s15), 1 }
   0xf   : > { %s525_s21 = sshll.u32 %s660_s15, 3  ;;  %s515_s22 = sshll.u32 %s660_s15, 2 }
  0x10   : > { %s264_s25 = scalar_lea.vmem %s650_s0, %s525_s21  ;;  %s269_s28 = scalar_lea.vmem %s651_s1, %s515_s22 }
  0x11   : > { %v290_v3 = vld [vmem:[%s264_s25] sm:$0xff]  ;;  %s278_s5 = scalar_lea.vmem %s653_s3, %s525_s21  ;;  %s288_s8 = scalar_lea.vmem %s654_s4, %s525_s21 }
  0x12   : > { %v299_v4 = vcombine.high %v290_v3, %v290_v3  ;;  %v291_v5 = vld [vmem:[%s269_s28] sm:$0x7] }
  0x13   : > { %v380_v6 = vld [vmem:[%s278_s5] sm:$0x77] }
  0x14   : > { %520 = vmatprep.subr.msk.mxu0 %vm304_vm0, %v299_v4  ;;  %v382_v9 = vcombine.high %v380_v6, %v380_v6 }
  0x15   : > { %521 = vmatpush1.msk.msra.mxu0 %vm304_vm0, %v290_v3 }
  0x16   : > { %522 = vmatmul.mubr.msk.f32.vlgmr.msra.gmra.mrb[0].mxu0 %vm300_vm1, %v291_v5 }
  0x87   : > { %v296_v7 = vpop.permute.xlu0 %295 }
  0xe9   : > { %v375_v8 = vpop.f32.mrb[0].mxu0 }
  0xea   : > { %v376_v10 = vadd.f32 %v375_v8, %v296_v7  ;;  %v377_v11 = vpop.f32.mrb[1].mxu0 }
  0xeb   : > { %v378_v12 = vadd.f32 %v377_v11, %v296_v7 }
  0xec   : > { %v384_v13 = vadd.f32 %v380_v6, %v376_v10 }
  0xed   : > { %v385_v14 = vadd.f32 %v382_v9, %v378_v12 }
  0xef   : > { %v388_v15 = vcombine.low %v384_v13, %v385_v14 }
  0xf1   : > { %390 = vst [vmem:[%s288_s8] sm:$0x77] %v388_v15 }
  0xf2 PF: > { %s14_s17 = sadd.s32 1, %s579_s17   ;;  %s655_s15 = smov %s575_s16 }
  0xf3   : > { %p11_p5 = scmp.ge.s32.totalorder %s14_s17, 4   ;;  %s656_s16 = smov %s658_s18 }
  0xf5   :  { %13 = sbr.rel (!%p11_p5) target bundleno = 2 (0x2), region = 72 }

</bundles_post_ra>
